<compile_context>
chip_gen: v5e
topology: v5e:2x2
jax: 0.10.0
libtpu: 0.0.40
codegen_flags: <defaults>
</compile_context>

<pallas_src>
import jax
import jax.numpy as jnp
from jax import lax
from jax.experimental import pallas as pl
from jax.experimental.pallas import tpu as pltpu


# --------------------------------------------------------------------------- helpers
def _round_up(x, m):
    return ((x + m - 1) // m) * m


def _pick_tile_n(n):
    """Largest point-tile (multiple of 16 for bf16 sublane packing) giving >=2 tiles."""
    n16 = _round_up(max(n, 16), 16)
    for c in (512, 256, 128, 64, 32, 16):
        if 2 * c <= n16:
            return c
    return 16


def _pick_cols(n, candidates):
    """Largest candidate that strictly divides n (>=2 tiles); fall back to full extent."""
    for c in candidates:
        if c < n and n % c == 0:
            return c
    return n


def _pad2(a, shape):
    return jnp.pad(a, [(0, s - d) for d, s in zip(a.shape, shape)])


def _vmem_cap_bytes():
    """Generation-aware scoped-VMEM ceiling: ~75% of physical VMEM per TensorCore."""
    cap = 128 << 20
    try:
        info = pltpu.get_tpu_info()
        for name in ("vmem_capacity_bytes", "vmem_size_bytes", "vmem_bytes"):
            v = getattr(info, name, None)
            if v:
                cap = int(v)
                break
    except Exception:
        pass
    return max((cap * 3) // 4, 24 << 20)


def _vmem_limit(nbytes, cap):
    return int(min(max(2 * nbytes + (2 << 20), 8 << 20), cap))


def _spec(block_shape, index_map, buffers=None):
    """BlockSpec, optionally with N-deep pipelining; falls back if unsupported."""
    if buffers and hasattr(pl, "Buffered"):
        try:
            return pl.BlockSpec(block_shape, index_map,
                                pipeline_mode=pl.Buffered(buffers))
        except TypeError:
            pass
    return pl.BlockSpec(block_shape, index_map)


# --------------------------------------------------------------------------- encoder
def _make_encoder_kernel(tiles_per, tile_n, n_valid, need_mask):
    def kernel(x_ref, we_ref, be_ref, tf_ref, feats_ref):
        """x:(B,tN,3) f32 | we:(3,c_pad) | be:(1,c_pad)
           tf:(B,tN,c_pad) bf16 lane-dense | feats:(1,B,c_pad) f32 running max."""
        b = x_ref.shape[0]
        c_pad = we_ref.shape[1]

        # K=3 contraction on the (otherwise idle) MXU, f32 accumulation.
        x2 = x_ref[...].reshape(b * tile_n, 3)
        h2 = jnp.dot(x2, we_ref[...], preferred_element_type=jnp.float32) + be_ref[...]
        h = jnp.maximum(h2, 0.0).reshape(b, tile_n, c_pad)

        # bf16 writeback: halves the dominant HBM traffic of the encoder.
        tf_ref[...] = h.astype(tf_ref.dtype)

        @pl.when(pl.program_id(1) == 0)
        def _():
            feats_ref[...] = jnp.full_like(feats_ref, -jnp.inf)

        hm = h
        if need_mask:  # padded points must not contribute ReLU(bias) to the max-pool
            tile_idx = pl.program_id(0) * tiles_per + pl.program_id(1)
            row = lax.broadcasted_iota(jnp.int32, (1, tile_n, 1), 1)
            hm = jnp.where(tile_idx * tile_n + row < n_valid, h, -jnp.inf)
        feats_ref[...] = jnp.maximum(feats_ref[...], jnp.max(hm, axis=1)[None])

    return kernel


# --------------------------------------------------------------------------- decoder
def _decoder_pre_kernel(f_ref, w10_ref, b10_ref, w11_ref, b11_ref,
                        w20_ref, b20_ref, w21_ref, b21_ref, ws2_ref, y2_ref):
    """fc_1 / fc_2 (ResnetBlockFC chain) -> y2.  Single invocation, all in VMEM."""
    relu = lambda t: jnp.maximum(t, 0.0)

    def mm(a, w_ref):  # bf16 x bf16 on the MXU, f32 accumulation
        return jnp.dot(a.astype(w_ref.dtype), w_ref[...],
                       preferred_element_type=jnp.float32)

    f = f_ref[...]
    # fc_1 = ResnetBlockFC(c_dim, h1); c_dim == h1 -> identity shortcut.
    net = mm(relu(f), w10_ref) + b10_ref[...]
    dx = mm(relu(net), w11_ref) + b11_ref[...]
    y1 = f + dx
    # fc_2 = ResnetBlockFC(h1, P); shortcut = Linear(h1, P, bias=False).
    net = mm(relu(y1), w20_ref) + b20_ref[...]
    dx = mm(relu(net), w21_ref) + b21_ref[...]
    y2_ref[...] = mm(y1, ws2_ref) + dx


def _fc_out_kernel(y2_ref, wout_ref, bout_ref, out_ref):
    """fc_out = Linear(P, 3*P), one lane-dense column tile per grid step."""
    out_ref[...] = (jnp.dot(y2_ref[...].astype(wout_ref.dtype), wout_ref[...],
                            preferred_element_type=jnp.float32)
                    + bout_ref[...])


# --------------------------------------------------------------------------- params
def init_params(key, c_dim=64, output_points_count=128):
    """Deterministic parameter init (shapes follow the module's __init__, scaled down).

    Decoder weights are bf16 (f32 accumulation in-kernel); biases are 2-D (1, dim).
    """
    assert output_points_count % 2 == 0
    h1 = c_dim                       # stand-in for PointDecoder's 1024 hidden width
    P = output_points_count
    sh2 = min(h1, P)                 # ResnetBlockFC size_h = min(size_in, size_out)

    ks = jax.random.split(key, 12)
    rnd = lambda k, shape: (0.1 * jax.random.normal(k, shape)).astype(jnp.float32)
    bf16 = lambda a: a.astype(jnp.bfloat16)

    params = {
        # synthetic PointNet encoder
        "we": rnd(ks[0], (3, c_dim)),
        "be": rnd(ks[1], (1, c_dim)),
        # decoder.fc_1 = ResnetBlockFC(c_dim, h1)  (second linear zero-init, as in torch)
        "w10": bf16(rnd(ks[2], (c_dim, h1))), "b10": rnd(ks[3], (1, h1)),
        "w11": jnp.zeros((h1, h1), jnp.bfloat16), "b11": rnd(ks[4], (1, h1)),
        # decoder.fc_2 = ResnetBlockFC(h1, P)
        "w20": bf16(rnd(ks[5], (h1, sh2))), "b20": rnd(ks[6], (1, sh2)),
        "w21": jnp.zeros((sh2, P), jnp.bfloat16), "b21": rnd(ks[7], (1, P)),
        "ws2": bf16(rnd(ks[8], (h1, P))),
        # decoder.fc_out = Linear(P, 3*P)
        "wout": bf16(rnd(ks[9], (P, 3 * P))), "bout": rnd(ks[10], (1, 3 * P)),
    }
    meta = {"c_dim": c_dim, "P": P}
    return params, meta


# --------------------------------------------------------------------------- forward
def point_completion_forward(x, params, meta):
    """Forward of PointCompletionNetwork (preserve_input=False, no world_mat).

    Returns (points_output, trans_feature), like the PyTorch module.
    trans_feature is returned in bf16 (HBM-writeback optimisation of the encoder).
    """
    B, N, _ = x.shape
    c_dim, P = meta["c_dim"], meta["P"]
    h1 = c_dim
    sh2 = min(h1, P)
    x = x.astype(jnp.float32)
    cap = _vmem_cap_bytes()

    # ------------------- encoder: tiled over N, parallel leading axis -------------------
    c_pad = _round_up(c_dim, 128)            # lane-dense feature width (no masked vst)
    tile_n = _pick_tile_n(N)                 # multiple of 16 (bf16 (16,128) tile)
    n_pad = _round_up(N, tile_n)
    n_tiles = n_pad // tile_n
    n_par = 2 if (n_tiles % 2 == 0 and n_tiles >= 2) else 1   # 2 TCs on v7x
    tiles_per = n_tiles // n_par
    need_mask = n_pad != N

    x_p = jnp.pad(x, ((0, 0), (0, n_pad - N), (0, 0))) if need_mask else x
    we_p = _pad2(params["we"], (3, c_pad))
    be_p = _pad2(params["be"], (1, c_pad))

    enc_blk = (B * tile_n * 3 * 4 + B * tile_n * c_pad * 2
               + B * c_pad * 4 + 4 * c_pad * 4)
    enc_cost = pl.CostEstimate(
        flops=6 * B * n_pad * c_pad, transcendentals=0,
        bytes_accessed=B * n_pad * 3 * 4 + B * n_pad * c_pad * 2
                       + n_par * B * c_pad * 4)

    tf_pad, feats_par = pl.pallas_call(
        _make_encoder_kernel(tiles_per, tile_n, N, need_mask),
        out_shape=(jax.ShapeDtypeStruct((B, n_pad, c_pad), jnp.bfloat16),
                   jax.ShapeDtypeStruct((n_par, B, c_pad), jnp.float32)),
        grid=(n_par, tiles_per),
        in_specs=[pl.BlockSpec((B, tile_n, 3),
                               lambda p, n: (0, p * tiles_per + n, 0)),
                  pl.BlockSpec((3, c_pad), lambda p, n: (0, 0)),
                  pl.BlockSpec((1, c_pad), lambda p, n: (0, 0))],
        out_specs=(pl.BlockSpec((B, tile_n, c_pad),
                                lambda p, n: (0, p * tiles_per + n, 0)),
                   pl.BlockSpec((1, B, c_pad), lambda p, n: (p, 0, 0))),
        compiler_params=pltpu.CompilerParams(
            dimension_semantics=("parallel", "arbitrary"),
            vmem_limit_bytes=_vmem_limit(enc_blk, cap)),
        cost_estimate=enc_cost,
    )(x_p, we_p, be_p)

    trans_feature = tf_pad[:, :N, :c_dim]            # bf16 per-point features
    feats = jnp.max(feats_par, axis=0)[:, :c_dim]    # combine per-core partial maxima

    # ------------------- decoder preamble: fc_1 / fc_2 -> y2 (tiny) -------------------
    Mp = max(8, _round_up(B, 8))                     # pad batch to a full sublane tile
    P_pad = _round_up(P, 128)                        # lane-dense y2 / fc_out contraction dim
    feats_mp = _pad2(feats, (Mp, c_dim))

    w21_p = _pad2(params["w21"], (sh2, P_pad))
    b21_p = _pad2(params["b21"], (1, P_pad))
    ws2_p = _pad2(params["ws2"], (h1, P_pad))

    pre_args = (feats_mp,
                params["w10"], params["b10"], params["w11"], params["b11"],
                params["w20"], params["b20"], w21_p, b21_p, ws2_p)
    pre_bytes = sum(int(a.size) * a.dtype.itemsize for a in pre_args) + Mp * P_pad * 4

    y2 = pl.pallas_call(
        _decoder_pre_kernel,
        out_shape=jax.ShapeDtypeStruct((Mp, P_pad), jnp.float32),
        compiler_params=pltpu.CompilerParams(
            vmem_limit_bytes=_vmem_limit(pre_bytes, cap)),
    )(*pre_args)

    # ------------- fc_out: column-tiled weight stream, parallel grid -------------
    P3 = 3 * P
    P3_pad = _round_up(P3, 128)                      # lane-dense fc_out output
    wout_p = _pad2(params["wout"], (P_pad, P3_pad))  # zero rows/cols: no contribution
    bout_p = _pad2(params["bout"], (1, P3_pad))

    big_vmem = cap >= (80 << 20)                     # v5e/v6e (128 MiB) vs v7x (64 MiB)
    col_cands = (2048, 1024, 512, 256, 128) if big_vmem else (512, 256, 128)
    t_cout = _pick_cols(P3_pad, col_cands)
    n_cols = P3_pad // t_cout
    n_buf = 3 if n_cols >= 3 else None               # deepen pipelining on the weight stream

    out_blk = (Mp * P_pad * 4
               + (n_buf or 2) * (P_pad * t_cout * 2 + t_cout * 4 + Mp * t_cout * 4))
    out_cost = pl.CostEstimate(
        flops=2 * Mp * P_pad * P3_pad, transcendentals=0,
        bytes_accessed=P_pad * P3_pad * 2 + P3_pad * 4
                       + Mp * P_pad * 4 + Mp * P3_pad * 4)

    points_pad = pl.pallas_call(
        _fc_out_kernel,
        out_shape=jax.ShapeDtypeStruct((Mp, P3_pad), jnp.float32),
        grid=(n_cols,),
        in_specs=[pl.BlockSpec((Mp, P_pad), lambda j: (0, 0)),            # y2 (resident)
                  _spec((P_pad, t_cout), lambda j: (0, j), buffers=n_buf),  # wout cols
                  _spec((1, t_cout), lambda j: (0, j), buffers=n_buf)],     # bout cols
        out_specs=pl.BlockSpec((Mp, t_cout), lambda j: (0, j)),
        compiler_params=pltpu.CompilerParams(
            dimension_semantics=("parallel",),       # no cross-step state -> shardable
            vmem_limit_bytes=_vmem_limit(out_blk, cap)),
        cost_estimate=out_cost,
    )(y2, wout_p, bout_p)

    # torch: fc_out output (B, 3P) reshaped row-major -> (B, P, 3)
    points_output = points_pad[:B, :P3].reshape(-1, P, 3)

    # TODO(synk): preserve_input=True path (pointnet2_utils.furthest_point_sample +
    # gather_operation) and the optional encoder_world_mat branch are not implemented.
    return points_output, trans_feature


# --------------------------------------------------------------------------- reference
def _reference_forward(x, params, meta):
    """Pure-JAX reference with matching numerics (bf16 decoder weights, f32 accumulation)."""
    P = meta["P"]
    relu = lambda t: jnp.maximum(t, 0.0)
    mm = lambda a, w: jnp.dot(a.astype(jnp.bfloat16), w,
                              preferred_element_type=jnp.float32)
    x = x.astype(jnp.float32)
    B, N, _ = x.shape
    h = relu(jnp.dot(x.reshape(-1, 3), params["we"],
                     precision=lax.Precision.HIGHEST) + params["be"]).reshape(B, N, -1)
    f = jnp.max(h, axis=1)
    net = mm(relu(f), params["w10"]) + params["b10"]
    dx = mm(relu(net), params["w11"]) + params["b11"]
    y1 = f + dx
    net = mm(relu(y1), params["w20"]) + params["b20"]
    dx = mm(relu(net), params["w21"]) + params["b21"]
    y2 = mm(y1, params["ws2"]) + dx
    out = mm(y2, params["wout"]) + params["bout"]
    return out.reshape(-1, P, 3), h


if __name__ == "__main__":
    key = jax.random.PRNGKey(0)
    pkey, xkey = jax.random.split(key)

    B, N = 2, 200                   # N=200 exercises N-padding + mask + parallel axis
    c_dim, P = 64, 128              # scaled-down c_dim (1024 -> 64), output points (2048 -> 128)

    params, meta = init_params(pkey, c_dim=c_dim, output_points_count=P)
    x = jax.random.normal(xkey, (B, N, 3), dtype=jnp.float32)

    points_output, trans_feature = point_completion_forward(x, params, meta)
    jax.block_until_ready((points_output, trans_feature))

    assert points_output.shape == (B, P, 3), points_output.shape
    assert trans_feature.shape == (B, N, c_dim), trans_feature.shape

    ref_points, ref_tf = _reference_forward(x, params, meta)
    tf_err = float(jnp.max(jnp.abs(trans_feature.astype(jnp.float32) - ref_tf)))
    pt_err = float(jnp.max(jnp.abs(points_output - ref_points)))
    assert tf_err < 2e-2, tf_err     # trans_feature is bf16 (writeback optimisation)
    assert pt_err < 2e-2, pt_err

    print("KERNEL_OK")
</pallas_src>

<mosaic_0001>
module attributes {stable_mosaic.version = 11 : i64} {
  func.func @kernel(%arg0: i32, %arg1: i32, %arg2: memref<2x64x3xf32, #tpu.memory_space<vmem>>, %arg3: memref<3x128xf32, #tpu.memory_space<vmem>>, %arg4: memref<1x128xf32, #tpu.memory_space<vmem>>, %arg5: memref<2x64x128xbf16, #tpu.memory_space<vmem>>, %arg6: memref<1x2x128xf32, #tpu.memory_space<vmem>>) attributes {dimension_semantics = [#tpu.dimension_semantics<parallel>, #tpu.dimension_semantics<arbitrary>], iteration_bounds = array<i64: 2, 2>, scalar_prefetch = 0 : i64, scratch_operands = 0 : i64, tpu.core_type = #tpu.core_type<tc>, window_params = [{transform_indices = @transform_0, window_bounds = array<i64: 2, 64, 3>}, {pipeline_mode = #tpu.pipeline_mode<synchronous>, transform_indices = @transform_1, window_bounds = array<i64: 3, 128>}, {pipeline_mode = #tpu.pipeline_mode<synchronous>, transform_indices = @transform_2, window_bounds = array<i64: 1, 128>}, {transform_indices = @transform_3, window_bounds = array<i64: 2, 64, 128>}, {transform_indices = @transform_4, window_bounds = array<i64: 1, 2, 128>}]} {
    %c0 = arith.constant 0 : index
    %c0_0 = arith.constant 0 : index
    %c0_1 = arith.constant 0 : index
    %0 = vector.load %arg2[%c0, %c0_0, %c0_1] : memref<2x64x3xf32, #tpu.memory_space<vmem>>, vector<2x64x3xf32>
    %1 = vector.shape_cast %0 : vector<2x64x3xf32> to vector<128x3xf32>
    %c0_2 = arith.constant 0 : index
    %c0_3 = arith.constant 0 : index
    %2 = vector.load %arg3[%c0_2, %c0_3] : memref<3x128xf32, #tpu.memory_space<vmem>>, vector<3x128xf32>
    %cst = arith.constant dense<0.000000e+00> : vector<128x128xf32>
    %3 = tpu.matmul %1, %2, %cst {dimension_numbers = #tpu.dot_dimension_numbers<[1], [0], [0], [1], [0, 0, 1, 1], [], []>} : vector<128x3xf32>, vector<3x128xf32>, vector<128x128xf32> -> vector<128x128xf32>
    %c0_4 = arith.constant 0 : index
    %c0_5 = arith.constant 0 : index
    %4 = vector.load %arg4[%c0_4, %c0_5] : memref<1x128xf32, #tpu.memory_space<vmem>>, vector<1x128xf32>
    %5 = vector.broadcast %4 : vector<1x128xf32> to vector<128x128xf32>
    %6 = arith.addf %3, %5 : vector<128x128xf32>
    %cst_6 = arith.constant 0.000000e+00 : f32
    %7 = vector.broadcast %cst_6 : f32 to vector<128x128xf32>
    %8 = arith.maximumf %6, %7 : vector<128x128xf32>
    %9 = vector.shape_cast %8 : vector<128x128xf32> to vector<2x64x128xf32>
    %10 = arith.truncf %9 : vector<2x64x128xf32> to vector<2x64x128xbf16>
    %c0_7 = arith.constant 0 : index
    %c0_8 = arith.constant 0 : index
    %c0_9 = arith.constant 0 : index
    %11 = vector.load %arg5[%c0_7, %c0_8, %c0_9] : memref<2x64x128xbf16, #tpu.memory_space<vmem>>, vector<2x64x128xbf16>
    tpu.vector_store %arg5[%c0_7, %c0_8, %c0_9], %10 {strides = array<i32>} : memref<2x64x128xbf16, #tpu.memory_space<vmem>>, vector<2x64x128xbf16>,
    %c0_i32 = arith.constant 0 : i32
    %12 = arith.cmpi eq, %arg1, %c0_i32 : i32
    %13 = arith.extui %12 : i1 to i32
    %c0_i32_10 = arith.constant 0 : i32
    %14 = arith.cmpi ne, %13, %c0_i32_10 : i32
    scf.if %14 {
      %cst_19 = arith.constant 0xFF800000 : f32
      %32 = vector.broadcast %cst_19 : f32 to vector<1x2x128xf32>
      %c0_20 = arith.constant 0 : index
      %c0_21 = arith.constant 0 : index
      %c0_22 = arith.constant 0 : index
      %33 = vector.load %arg6[%c0_20, %c0_21, %c0_22] : memref<1x2x128xf32, #tpu.memory_space<vmem>>, vector<1x2x128xf32>
      tpu.vector_store %arg6[%c0_20, %c0_21, %c0_22], %32 {strides = array<i32>} : memref<1x2x128xf32, #tpu.memory_space<vmem>>, vector<1x2x128xf32>,
    } else {
    }
    %c2_i32 = arith.constant 2 : i32
    %15 = arith.muli %arg0, %c2_i32 : i32
    %16 = arith.addi %15, %arg1 : i32
    %17 = tpu.iota {dimensions = array<i32: 1>} : vector<1x64x1xi32>
    %c64_i32 = arith.constant 64 : i32
    %18 = arith.muli %16, %c64_i32 : i32
    %19 = vector.broadcast %18 : i32 to vector<1x64x1xi32>
    %20 = arith.addi %19, %17 : vector<1x64x1xi32>
    %c200_i32 = arith.constant 200 : i32
    %21 = vector.broadcast %c200_i32 : i32 to vector<1x64x1xi32>
    %22 = arith.cmpi slt, %20, %21 : vector<1x64x1xi32>
    %cst_11 = arith.constant 0xFF800000 : f32
    %23 = vector.shape_cast %22 : vector<1x64x1xi1> to vector<1x64x1xi1>
    %24 = vector.broadcast %23 : vector<1x64x1xi1> to vector<2x64x128xi1>
    %25 = vector.broadcast %cst_11 : f32 to vector<2x64x128xf32>
    %26 = arith.select %24, %9, %25 : vector<2x64x128xi1>, vector<2x64x128xf32>
    %c0_12 = arith.constant 0 : index
    %c0_13 = arith.constant 0 : index
    %c0_14 = arith.constant 0 : index
    %27 = vector.load %arg6[%c0_12, %c0_13, %c0_14] : memref<1x2x128xf32, #tpu.memory_space<vmem>>, vector<1x2x128xf32>
    %cst_15 = arith.constant dense<0xFF800000> : vector<2x128xf32>
    %28 = vector.multi_reduction <maximumf>, %26, %cst_15 [1] : vector<2x64x128xf32> to vector<2x128xf32>
    %29 = vector.shape_cast %28 : vector<2x128xf32> to vector<1x2x128xf32>
    %30 = arith.maximumf %27, %29 : vector<1x2x128xf32>
    %c0_16 = arith.constant 0 : index
    %c0_17 = arith.constant 0 : index
    %c0_18 = arith.constant 0 : index
    %31 = vector.load %arg6[%c0_16, %c0_17, %c0_18] : memref<1x2x128xf32, #tpu.memory_space<vmem>>, vector<1x2x128xf32>
    tpu.vector_store %arg6[%c0_16, %c0_17, %c0_18], %30 {strides = array<i32>} : memref<1x2x128xf32, #tpu.memory_space<vmem>>, vector<1x2x128xf32>,
    return
  }
  func.func @transform_0(%arg0: i32, %arg1: i32) -> (i32, i32, i32) {
    %c2_i32 = arith.constant 2 : i32
    %0 = arith.muli %arg0, %c2_i32 : i32
    %1 = arith.addi %0, %arg1 : i32
    %c0_i32 = arith.constant 0 : i32
    %c0_i32_0 = arith.constant 0 : i32
    %c0_i32_1 = arith.constant 0 : i32
    return %c0_i32, %1, %c0_i32_0 : i32, i32, i32
  }
  func.func @transform_1(%arg0: i32, %arg1: i32) -> (i32, i32) {
    %c0_i32 = arith.constant 0 : i32
    %c0_i32_0 = arith.constant 0 : i32
    %c0_i32_1 = arith.constant 0 : i32
    return %c0_i32, %c0_i32_0 : i32, i32
  }
  func.func @transform_2(%arg0: i32, %arg1: i32) -> (i32, i32) {
    %c0_i32 = arith.constant 0 : i32
    %c0_i32_0 = arith.constant 0 : i32
    %c0_i32_1 = arith.constant 0 : i32
    return %c0_i32, %c0_i32_0 : i32, i32
  }
  func.func @transform_3(%arg0: i32, %arg1: i32) -> (i32, i32, i32) {
    %c2_i32 = arith.constant 2 : i32
    %0 = arith.muli %arg0, %c2_i32 : i32
    %1 = arith.addi %0, %arg1 : i32
    %c0_i32 = arith.constant 0 : i32
    %c0_i32_0 = arith.constant 0 : i32
    %c0_i32_1 = arith.constant 0 : i32
    return %c0_i32, %1, %c0_i32_0 : i32, i32, i32
  }
  func.func @transform_4(%arg0: i32, %arg1: i32) -> (i32, i32, i32) {
    %c0_i32 = arith.constant 0 : i32
    %c0_i32_0 = arith.constant 0 : i32
    %c0_i32_1 = arith.constant 0 : i32
    return %arg0, %c0_i32, %c0_i32_0 : i32, i32, i32
  }
}

</mosaic_0001>

<bundles_post_ra>
// kernel: tpu_custom_call.1
= control target key start
LH: loop header
LB: loop body
LE: loop exit
PB: predicated region body
PF: predicated region fallthrough
CT: control target
= control target key end

     0   :  { %s1539_s0 = inlined_call_operand.vmem [shape: f32[2,256,3], index: 0, kind: input, shape index: {}]   ;;  %s1540_s1 = inlined_call_operand.vmem [shape: f32[3,128], index: 1, kind: input, shape index: {}]   ;;  %s1541_s2 = inlined_call_operand.vmem [shape: f32[1,128], index: 2, kind: input, shape index: {}]   ;;  %s1542_s3 = inlined_call_operand.hbm [shape: bf16[2,256,128], index: 3, kind: output, shape index: {0}]   ;;  %s1543_s4 = inlined_call_operand.hbm [shape: f32[2,2,128], index: 4, kind: output, shape index: {1}]  }
   0x1   :  { %1549 = sst [smem:[#allocation15_spill]] %s1539_s0 }
   0x2   :  { %1550 = sst [smem:[#allocation16_spill]] %s1540_s1 }
   0x3   :  { %1551 = sst [smem:[#allocation17_spill]] %s1541_s2 }
   0x4   :  { %1552 = sst [smem:[#allocation18_spill]] %s1542_s3 }
   0x5   :  { %10 = vsyncpa [#allocation4], 0 }
   0x6   :  { %12 = vsyncpa [#allocation4 + $0x1], 0 }
   0x7   :  { %13 = vsyncpa [#allocation6], 0 }
   0x8   :  { %15 = vsyncpa [#allocation6 + $0x1], 0  ;;  %s1162_s15 = smov 0   ;;  %s1164_s16 = smov 0  }
   0x9   :  { %s1166_s17 = smov 0   ;;  %s1168_s18 = smov 0  }
   0xa   :  { %s1170_s19 = smov 0   ;;  %s1172_s20 = smov 0  }
   0xb   :  { %s1174_s21 = smov 0   ;;  %s1176_s22 = smov 0  }
   0xc   :  { %s1178_s23 = smov 0   ;;  %s1180_s24 = smov 0  }
   0xd   :  { %s1182_s25 = smov 0  }
   0xe LB: > { %1553 = sst [smem:[#allocation11_spill]] %s1099_s18  ;;  %s794_s26 = sadd.s32 4294967295, %s1127_s25   ;;  %s1127_s25 = sphi %s1182_s25, %s21_s25   ;;  %s1123_s24 = sphi %s1180_s24, %s1581_s24   ;;  %s1119_s23 = sphi %s1178_s23, %s1580_s23   ;;  %s1115_s22 = sphi %s1176_s22, %s1579_s22   ;;  %s1111_s21 = sphi %s1174_s21, %s1570_s21   ;;  %s1107_s20 = sphi %s1172_s20, %s1578_s20   ;;  %s1103_s19 = sphi %s1170_s19, %s1577_s19   ;;  %s1099_s18 = sphi %s1168_s18, %s1576_s18   ;;  %s1095_s17 = sphi %s1166_s17, %s1575_s17   ;;  %s1091_s16 = sphi %s1164_s16, %s1574_s16   ;;  %s1087_s15 = sphi %s1162_s15, %s1573_s15  }
   0xf   : > { %1554 = sst [smem:[#allocation12_spill]] %s1119_s23  ;;  %s795_s27 = sadd.s32 4294967294, %s1127_s25  }
  0x10   : > { %s30_s28 = sadd.s32 1, %s1119_s23  ;;  %s33_s29 = sadd.s32 1, %s1123_s24 }
  0x11   : > { %p31_p0 = scmp.ge.s32.totalorder %s30_s28, 2  ;;  %s796_s30 = sshll.u32 %s1123_s24, 1 }
  0x12   : > { %s1223_s5 = sadd.s32 %s1119_s23, %s796_s30  ;;  %s44_s6 = sadd.s32 1, %s1107_s20 }
  0x13   : > { %s1583_s28 = smov (%p31_p0, %s30_s28), 0  ;;  %s1585_s29 = smov (!%p31_p0, %s33_s29), %s1123_s24 }
  0x14   : > { %1555 = sst [smem:[#allocation13_spill]] %s1583_s28  ;;  %p51_p1 = scmp.ne.s32.totalorder %s1107_s20, %s1103_s19 }
  0x15   : > { %p52_p2 = scmp.eq.s32.totalorder %s1127_s25, 0  ;;  %p35_p3 = scmp.ge.s32.totalorder %s1585_s29, 2 }
  0x16   : > { %p1232_p4 = scmp.eq.s32.totalorder %s794_s26, 3  ;;  %p132_p6 = scmp.ne.s32.totalorder %s1103_s19, %s1099_s18 }
  0x17   : > { %p1236_p5 = por %p52_p2, %p51_p1  ;;  %s1587_s29 = smov (%p35_p3, %s1585_s29), 0 }
  0x18   : > { %1558 = sst [smem:[#allocation14_spill]] %s1587_s29  ;;  %p1246_p7 = por %p1232_p4, %p51_p1 }
  0x19   : > { %p1250_p8 = scmp.eq.s32.totalorder %s795_s27, 3  ;;  %s797_s11 = sshll.u32 %s1587_s29, 1 }
  0x1a   : > { %s139_s12 = ssub.s32 %s1123_s24, %s1587_s29  ;;  %s40_s13 = sadd.s32 %s797_s11, %s1583_s28 }
  0x1b   : > { %p1260_p9 = por %p1250_p8, %p132_p6  ;;  %s41_s26 = ssub.s32 %s1223_s5, %s40_s13 }
  0x1c   : > { %p140_p10 = scmp.eq.s32.totalorder %s139_s12, 0  ;;  %p42_p11 = scmp.eq.s32.totalorder %s41_s26, 0 }
  0x1d   : > { %s142_s30 = sadd.s32 1, %s1095_s17  ;;  %p152_p12 = scmp.ne.s32.totalorder %s1095_s17, %s1091_s16 }
  0x1e   : > { %s1267_s23 = scalar_select %p140_p10, %s1095_s17, %s142_s30  }
  0x1f   : > { %s1270_s27 = scalar_select %p42_p11, %s1107_s20, %s44_s6  }
  0x20   : > { %p158_p13 = scmp.ne.s32.totalorder %s1091_s16, %s1087_s15  ;;  %p1278_p0 = por %p152_p12, %p1232_p4 }
  0x21   : > { %p801_p2 = scmp.ge.s32.totalorder %s1127_s25, 4 }
  0x22   : > { %p1284_p1 = por %p158_p13, %p1250_p8 }
  0x23   : > { %181 = sbr.rel (%p801_p2) target bundleno = 66 (0x42), region = 24 }
  0x28   : > { %184 = sbr.rel (!%p1236_p5) target bundleno = 66 (0x42), region = 28  ;;  %s186_s6 = sand.u32 (%p1236_p5), 1, %s1107_s20  }
  0x29   : > { %s838_s12 = sshll.u32 (%p1236_p5), %s1223_s5, 6  ;;  %s802_s7 = sshll.u32 (%p1236_p5), %s186_s6, 7 }
  0x2a   : > { %s1564_s0 = sld [smem:[#allocation15_spill]] (%p1236_p5)  ;;  %s188_s5 = scalar_lea.vmem (%p1236_p5), [#allocation2], %s802_s7 }
  0x30   : > { %s1296_s30 = scalar_lea.vmem %s1564_s0, %s838_s12 }
  0x31   : > { %v252_v0 = vld [vmem:[%s1296_s30] sm:$0xff]  ;;  %v254_v1 = vld [vmem:[%s1296_s30 + $0x8] sm:$0xff]  ;;  %v256_v2 = vld [vmem:[%s1296_s30 + $0x10] sm:$0xff] }
  0x32   : > { %253 = vst [vmem:[%s188_s5] sm:$0xff] %v252_v0  ;;  %v258_v3 = vld [vmem:[%s1296_s30 + $0x18] sm:$0xff]  ;;  %v260_v4 = vld [vmem:[%s1296_s30 + $0x20] sm:$0xff]  ;;  %v262_v5 = vld [vmem:[%s1296_s30 + $0x28] sm:$0xff] }
  0x33   : > { %255 = vst [vmem:[%s188_s5 + $0x8] sm:$0xff] %v254_v1  ;;  %v264_v6 = vld [vmem:[%s1296_s30 + $0x30] sm:$0xff]  ;;  %v266_v7 = vld [vmem:[%s1296_s30 + $0x38] sm:$0xff]  ;;  %v268_v8 = vld [vmem:[%s1296_s30 + $0x100] sm:$0xff] }
  0x34   : > { %257 = vst [vmem:[%s188_s5 + $0x10] sm:$0xff] %v256_v2  ;;  %v270_v9 = vld [vmem:[%s1296_s30 + $0x108] sm:$0xff]  ;;  %v272_v10 = vld [vmem:[%s1296_s30 + $0x110] sm:$0xff]  ;;  %v274_v11 = vld [vmem:[%s1296_s30 + $0x118] sm:$0xff] }
  0x35   : > { %259 = vst [vmem:[%s188_s5 + $0x18] sm:$0xff] %v258_v3  ;;  %v276_v12 = vld [vmem:[%s1296_s30 + $0x120] sm:$0xff]  ;;  %v278_v13 = vld [vmem:[%s1296_s30 + $0x128] sm:$0xff]  ;;  %v280_v14 = vld [vmem:[%s1296_s30 + $0x130] sm:$0xff] }
  0x36   : > { %261 = vst [vmem:[%s188_s5 + $0x20] sm:$0xff] %v260_v4  ;;  %v282_v15 = vld [vmem:[%s1296_s30 + $0x138] sm:$0xff] }
  0x37   : > { %263 = vst [vmem:[%s188_s5 + $0x28] sm:$0xff] %v262_v5 }
  0x38   : > { %265 = vst [vmem:[%s188_s5 + $0x30] sm:$0xff] %v264_v6 }
  0x39   : > { %267 = vst [vmem:[%s188_s5 + $0x38] sm:$0xff] %v266_v7 }
  0x3a   : > { %269 = vst [vmem:[%s188_s5 + $0x40] sm:$0xff] %v268_v8 }
  0x3b   : > { %271 = vst [vmem:[%s188_s5 + $0x48] sm:$0xff] %v270_v9 }
  0x3c   : > { %273 = vst [vmem:[%s188_s5 + $0x50] sm:$0xff] %v272_v10 }
  0x3d   : > { %275 = vst [vmem:[%s188_s5 + $0x58] sm:$0xff] %v274_v11 }
  0x3e   : > { %277 = vst [vmem:[%s188_s5 + $0x60] sm:$0xff] %v276_v12 }
  0x3f   : > { %279 = vst [vmem:[%s188_s5 + $0x68] sm:$0xff] %v278_v13 }
  0x40   : > { %281 = vst [vmem:[%s188_s5 + $0x70] sm:$0xff] %v280_v14 }
  0x41   : > { %283 = vst [vmem:[%s188_s5 + $0x78] sm:$0xff] %v282_v15 }
  0x42 PF: > { %p806_p3 = scmp.ge.s32.totalorder %s1127_s25, 1  ;;  %p288_p4 = scmp.lt.s32.totalorder %s1127_s25, 5 }
  0x44   : > { %p289_p5 = pnand %p806_p3, %p288_p4 }
  0x45   : > { %s322_s8 = sand.u32 (!%p289_p5), 1, %s1091_s16   ;;  %s1565_s1 = sld [smem:[#allocation16_spill]] (!%p289_p5) }
  0x46   : > { %292 = sbr.rel (%p289_p5) target bundleno = 307 (0x133), region = 66  ;;  %s1321_s12 = sand.u32 (!%p289_p5), 1, %s1103_s19  }
  0x47   : > { %s1325_s7 = sshll.u32 (!%p289_p5), %s322_s8, 1  ;;  %s807_s13 = sshll.u32 (!%p289_p5), %s1321_s12, 7 }
  0x48   : > { %s297_s26 = scalar_lea.vmem (!%p289_p5), [#allocation2], %s807_s13  ;;  %s1566_s2 = sld [smem:[#allocation17_spill]] (!%p289_p5) }
  0x49   : > { %s808_s10 = sshll.u32 (!%p289_p5), %s1321_s12, 6  ;;  %s1421_s13 = scalar_lea.vmem (!%p289_p5), [#allocation5], %s1325_s7 }
  0x4a   : > { %s1372_s6 = scalar_lea.vmem (!%p289_p5), [#allocation3], %s808_s10  ;;  %p827_p6 = scmp.ne.s32.totalorder (!%p289_p5), %s1111_s21, 0 }
  0x4b   : > { %v347_v16 = vld [vmem:[%s1565_s1] sm:$0x7]  ;;  %vm401_vm0 = vcmask 1042432   ;;  %vm352_vm1 = vcmask 23552   ;;  %v332_v21 = vld [vmem:[%s297_s26 + $0x8] sm:$0xff]  ;;  %v333_v25 = vld [vmem:[%s297_s26 + $0x10] sm:$0xff] }
  0x4c   : > { %810 = vmatpush.msk.msra.mxu0 %vm401_vm0, %v347_v16  ;;  %887 = vmatpush.msk.msra.mxu1 %vm401_vm0, %v347_v16  ;;  %v331_v17 = vld [vmem:[%s297_s26] sm:$0xff]  ;;  %v336_v22 = vld [vmem:[%s297_s26 + $0x28] sm:$0xff]  ;;  %v337_v26 = vld [vmem:[%s297_s26 + $0x30] sm:$0xff] }
  0x4d   : > { %888 = vmatpush.msk.msra.mxu2 %vm401_vm0, %v347_v16  ;;  %889 = vmatpush.msk.msra.mxu3 %vm401_vm0, %v347_v16  ;;  %v335_v18 = vld [vmem:[%s297_s26 + $0x20] sm:$0xff]  ;;  %v340_v23 = vld [vmem:[%s297_s26 + $0x48] sm:$0xff]  ;;  %v341_v27 = vld [vmem:[%s297_s26 + $0x50] sm:$0xff] }
  0x4e   : > { %v339_v19 = vld [vmem:[%s297_s26 + $0x40] sm:$0xff]  ;;  %811 = vmatmul.msk.f32.vlgmr.msra.gmra.mxu0 %vm352_vm1, %v331_v17  ;;  %815 = vmatmul.msk.f32.vlgmr.msra.gmra.mxu1 %vm352_vm1, %v335_v18  ;;  %v344_v24 = vld [vmem:[%s297_s26 + $0x68] sm:$0xff]  ;;  %v345_v28 = vld [vmem:[%s297_s26 + $0x70] sm:$0xff] }
  0x4f   : > { %v343_v20 = vld [vmem:[%s297_s26 + $0x60] sm:$0xff]  ;;  %819 = vmatmul.msk.f32.vlgmr.msra.gmra.mxu2 %vm352_vm1, %v339_v19  ;;  %v334_v29 = vld [vmem:[%s297_s26 + $0x18] sm:$0xff] }
  0x50   : > { %823 = vmatmul.msk.f32.vlgmr.msra.gmra.mxu3 %vm352_vm1, %v343_v20  ;;  %v338_v30 = vld [vmem:[%s297_s26 + $0x38] sm:$0xff]  ;;  %v1004_v35 = vld [vmem:[%s1566_s2] ss:$0 sm:$0xff] }
  0x51   : > { %v342_v31 = vld [vmem:[%s297_s26 + $0x58] sm:$0xff] }
  0x52   : > { %v346_v32 = vld [vmem:[%s297_s26 + $0x78] sm:$0xff] }
  0x56   : > { %812 = vmatmul.msk.f32.gmra.mxu0 %vm352_vm1, %v332_v21  ;;  %816 = vmatmul.msk.f32.gmra.mxu1 %vm352_vm1, %v336_v22 }
  0x57   : > { %820 = vmatmul.msk.f32.gmra.mxu2 %vm352_vm1, %v340_v23 }
  0x58   : > { %824 = vmatmul.msk.f32.gmra.mxu3 %vm352_vm1, %v344_v24 }
  0x5e   : > { %813 = vmatmul.msk.f32.gmra.mxu0 %vm352_vm1, %v333_v25  ;;  %817 = vmatmul.msk.f32.gmra.mxu1 %vm352_vm1, %v337_v26 }
  0x5f   : > { %821 = vmatmul.msk.f32.gmra.mxu2 %vm352_vm1, %v341_v27 }
  0x60   : > { %825 = vmatmul.msk.f32.gmra.mxu3 %vm352_vm1, %v345_v28 }
  0x66   : > { %814 = vmatmul.msk.f32.gmra.mxu0 %vm352_vm1, %v334_v29  ;;  %818 = vmatmul.msk.f32.gmra.mxu1 %vm352_vm1, %v338_v30 }
  0x67   : > { %822 = vmatmul.msk.f32.gmra.mxu2 %vm352_vm1, %v342_v31 }
  0x68   : > { %826 = vmatmul.msk.f32.gmra.mxu3 %vm352_vm1, %v346_v32 }
  0xcb   : > { %v422_v33 = vpop.f32.mrf.mxu0  ;;  %v434_v34 = vpop.f32.mrf.mxu1 }
  0xcc   : > { %v1347_v36 = vadd.f32 %v1004_v35, %v422_v33  ;;  %v1349_v37 = vadd.f32 %v1004_v35, %v434_v34 }
  0xce   : > { %v470_v44 = vmax.f32 %v1347_v36, 0.0  ;;  %v474_v45 = vmax.f32 %v1349_v37, 0.0 }
  0xd2   : > { %v446_v38 = vpop.f32.mrf.mxu2 }
  0xd3   : > { %v458_v39 = vpop.f32.mrf.mxu3  ;;  %v425_v40 = vpop.f32.mrf.mxu0  ;;  %v1368_v50 = vadd.f32 %v1004_v35, %v446_v38 }
  0xd4   : > { %v437_v41 = vpop.f32.mrf.mxu1  ;;  %v1352_v42 = vadd.f32 %v1004_v35, %v425_v40  ;;  %v1370_v51 = vadd.f32 %v1004_v35, %v458_v39 }
  0xd5   : > { %v1354_v43 = vadd.f32 %v1004_v35, %v437_v41  ;;  %v478_v58 = vmax.f32 %v1368_v50, 0.0 }
  0xd6   : > { %v471_v46 = vmax.f32 %v1352_v42, 0.0  ;;  %v482_v59 = vmax.f32 %v1370_v51, 0.0 }
  0xd7   : > { %v475_v47 = vmax.f32 %v1354_v43, 0.0 }
  0xd8   : > { %v843_v48 = vpack.c.bf16 %v471_v46, %v470_v44 }
  0xd9   : > { %v853_v49 = vpack.c.bf16 %v475_v47, %v474_v45 }
  0xda   : > { %844 = vst [vmem:[%s1372_s6] sm:$0xff] %v843_v48   ;;  %v449_v52 = vpop.f32.mrf.mxu2 }
  0xdb   : > { %v461_v53 = vpop.f32.mrf.mxu3  ;;  %881 = vst [vmem:[%s1372_s6 + $0x10] sm:$0xff] %v853_v49   ;;  %v1376_v54 = vadd.f32 %v1004_v35, %v449_v52  ;;  %v428_v56 = vpop.f32.mrf.mxu0 }
  0xdc   : > { %v1378_v55 = vadd.f32 %v1004_v35, %v461_v53  ;;  %v440_v57 = vpop.f32.mrf.mxu1  ;;  %v1394_v0 = vadd.f32 %v1004_v35, %v428_v56 }
  0xdd   : > { %v479_v60 = vmax.f32 %v1376_v54, 0.0  ;;  %v1396_v1 = vadd.f32 %v1004_v35, %v440_v57 }
  0xde   : > { %v483_v61 = vmax.f32 %v1378_v55, 0.0  ;;  %v472_v8 = vmax.f32 %v1394_v0, 0.0 }
  0xdf   : > { %v863_v62 = vpack.c.bf16 %v479_v60, %v478_v58  ;;  %v476_v9 = vmax.f32 %v1396_v1, 0.0 }
  0xe0   : > { %v873_v63 = vpack.c.bf16 %v483_v61, %v482_v59 }
  0xe1   : > { %883 = vst [vmem:[%s1372_s6 + $0x20] sm:$0xff] %v863_v62  }
  0xe2   : > { %885 = vst [vmem:[%s1372_s6 + $0x30] sm:$0xff] %v873_v63   ;;  %v452_v2 = vpop.f32.mrf.mxu2 }
  0xe3   : > { %v464_v3 = vpop.f32.mrf.mxu3  ;;  %v431_v4 = vpop.f32.mrf.mxu0  ;;  %v453_v14 = vadd.f32 %v1004_v35, %v452_v2 }
  0xe4   : > { %v443_v5 = vpop.f32.mrf.mxu1  ;;  %v1398_v6 = vadd.f32 %v1004_v35, %v431_v4  ;;  %v1410_v15 = vadd.f32 %v1004_v35, %v464_v3 }
  0xe5   : > { %v1400_v7 = vadd.f32 %v1004_v35, %v443_v5  ;;  %v480_v20 = vmax.f32 %v453_v14, 0.0 }
  0xe6   : > { %v473_v10 = vmax.f32 %v1398_v6, 0.0  ;;  %v484_v21 = vmax.f32 %v1410_v15, 0.0 }
  0xe7   : > { %v477_v11 = vmax.f32 %v1400_v7, 0.0 }
  0xe8   : > { %v848_v12 = vpack.c.bf16 %v473_v10, %v472_v8 }
  0xe9   : > { %v858_v13 = vpack.c.bf16 %v477_v11, %v476_v9 }
  0xea   : > { %880 = vst [vmem:[%s1372_s6 + $0x8] sm:$0xff] %v848_v12   ;;  %v455_v16 = vpop.f32.mrf.mxu2 }
  0xeb   : > { %v467_v17 = vpop.f32.mrf.mxu3  ;;  %882 = vst [vmem:[%s1372_s6 + $0x18] sm:$0xff] %v858_v13   ;;  %v456_v18 = vadd.f32 %v1004_v35, %v455_v16 }
  0xec   : > { %v1414_v19 = vadd.f32 %v1004_v35, %v467_v17 }
  0xed   : > { %v481_v22 = vmax.f32 %v456_v18, 0.0 }
  0xee   : > { %v485_v23 = vmax.f32 %v1414_v19, 0.0  ;;  %521 = sbr.rel (%p827_p6) target bundleno = 245 (0xf5), region = 74 }
  0xef   : > { %v868_v24 = vpack.c.bf16 %v481_v22, %v480_v20 }
  0xf0   : > { %v878_v25 = vpack.c.bf16 %v485_v23, %v484_v21 }
  0xf1   : > { %884 = vst [vmem:[%s1372_s6 + $0x28] sm:$0xff] %v868_v24  }
  0xf2   : > { %886 = vst [vmem:[%s1372_s6 + $0x38] sm:$0xff] %v878_v25  }
  0xf3   : > { %v1129_v26 = vmov -inf  }
  0xf4   : > { %522 = vst [vmem:[%s1421_s13] sm:$0x3] %v1129_v26 }
  0xf5 PF: > { %s1546_s26 = sshll.u32 %s1115_s22, 1  ;;  %v525_v27 = vlaneseq  ;;  %vm613_vm10 = vcmask 1041409   ;;  %s1461_s7 = scalar_lea.sflag [#allocation6], %s322_s8 }
  0xf6   : > { %s1429_s30 = sadd.s32 %s1111_s21, %s1546_s26  ;;  %s619_s21 = scalar_lea.sflag [#allocation4], %s1321_s12 }
  0xf7   : > { %v526_v28 = vshrl.u32 %v525_v27, 7  ;;  %s829_s5 = sshll.u32 %s1429_s30, 6 }
  0xf8   : > { %v535_v29 = vstv %s829_s5 }
  0xf9   : > { %v527_v30 = vadd.s32 8, %v526_v28  ;;  %v528_v31 = vadd.s32 16, %v526_v28  ;;  %v529_v32 = vadd.s32 24, %v526_v28  ;;  %v530_v33 = vadd.s32 32, %v526_v28 }
  0xfa   : > { %v531_v34 = vadd.s32 40, %v526_v28  ;;  %v532_v35 = vadd.s32 48, %v526_v28  ;;  %v533_v38 = vadd.s32 56, %v526_v28  ;;  %v536_v39 = vadd.s32 %v535_v29, %v526_v28 }
  0xfb   : > { %v537_v40 = vadd.s32 %v535_v29, %v527_v30  ;;  %v538_v41 = vadd.s32 %v535_v29, %v528_v31  ;;  %v539_v48 = vadd.s32 %v535_v29, %v529_v32  ;;  %v540_v49 = vadd.s32 %v535_v29, %v530_v33 }
  0xfc   : > { %v541_v52 = vadd.s32 %v535_v29, %v531_v34  ;;  %v542_v53 = vadd.s32 %v535_v29, %v532_v35  ;;  %v543_v56 = vadd.s32 %v535_v29, %v533_v38  ;;  %vm544_vm2 = vcmp.lt.s32.totalorder %v536_v39, 200 }
  0xfd   : > { %vm545_vm3 = vcmp.lt.s32.totalorder %v537_v40, 200  ;;  %vm546_vm4 = vcmp.lt.s32.totalorder %v538_v41, 200  ;;  %vm547_vm5 = vcmp.lt.s32.totalorder %v539_v48, 200  ;;  %vm548_vm6 = vcmp.lt.s32.totalorder %v540_v49, 200 }
  0xfe   : > { %vm549_vm7 = vcmp.lt.s32.totalorder %v541_v52, 200  ;;  %vm550_vm8 = vcmp.lt.s32.totalorder %v542_v53, 200  ;;  %v568_v57 = vsel %vm544_vm2, %v470_v44, -inf  ;;  %v570_v62 = vsel %vm546_vm4, %v472_v8, -inf }
  0xff   : > { %vm551_vm9 = vcmp.lt.s32.totalorder %v543_v56, 200  ;;  %v569_v63 = vsel %vm545_vm3, %v471_v46, -inf  ;;  %v571_v0 = vsel %vm547_vm5, %v473_v10, -inf  ;;  %v576_v2 = vsel %vm544_vm2, %v478_v58, -inf }
 0x100   : > { %v572_v3 = vsel %vm548_vm6, %v474_v45, -inf  ;;  %v577_v4 = vsel %vm545_vm3, %v479_v60, -inf  ;;  %v578_v5 = vsel %vm546_vm4, %v480_v20, -inf  ;;  %v579_v6 = vsel %vm547_vm5, %v481_v22, -inf }
 0x101   : > { %v573_v36 = vsel %vm549_vm7, %v475_v47, -inf  ;;  %v580_v44 = vsel %vm548_vm6, %v482_v59, -inf  ;;  %v581_v42 = vsel %vm549_vm7, %v483_v61, -inf  ;;  %v585_v46 = vmax.f32 %v568_v57, %v570_v62 }
 0x102   : > { %v574_v37 = vsel %vm550_vm8, %v476_v9, -inf  ;;  %v586_v45 = vmax.f32 %v569_v63, %v571_v0  ;;  %v598_v50 = vmax.f32 %v576_v2, %v578_v5  ;;  %v599_v54 = vmax.f32 %v577_v4, %v579_v6 }
 0x103   : > { %v575_v58 = vsel %vm551_vm9, %v477_v11, -inf  ;;  %v582_v43 = vsel %vm550_vm8, %v484_v21, -inf  ;;  %v583_v47 = vsel %vm551_vm9, %v485_v23, -inf  ;;  %v587_v51 = vmax.f32 %v585_v46, %v572_v3  ;;  %v584_v21 = vld [vmem:[%s1421_s13] sm:$0x3] }
 0x104   : > { %v588_v59 = vmax.f32 %v586_v45, %v573_v36  ;;  %v600_v55 = vmax.f32 %v598_v50, %v580_v44  ;;  %v601_v60 = vmax.f32 %v599_v54, %v581_v42 }
 0x105   : > { %v589_v61 = vmax.f32 %v587_v51, %v574_v37 }
 0x106   : > { %v590_v8 = vmax.f32 %v588_v59, %v575_v58  ;;  %v602_v1 = vmax.f32 %v600_v55, %v582_v43  ;;  %v603_v9 = vmax.f32 %v601_v60, %v583_v47 }
 0x108   : > { %v591_v10 = vmax.f32 %v589_v61, %v590_v8  ;;  %v604_v12 = vmax.f32 %v602_v1, %v603_v9 }
 0x10a   : > { %v592_v13 = vrot.slane %v591_v10, 4  ;;  %v605_v7 = vrot.slane %v604_v12, 4 }
 0x10c   : > { %v593_v11 = vmax.f32 %v591_v10, %v592_v13  ;;  %v606_v14 = vmax.f32 %v604_v12, %v605_v7 }
 0x10e   : > { %v594_v15 = vrot.slane %v593_v11, 2  ;;  %v607_v16 = vrot.slane %v606_v14, 2 }
 0x110   : > { %v595_v17 = vmax.f32 %v593_v11, %v594_v15  ;;  %v608_v18 = vmax.f32 %v606_v14, %v607_v16 }
 0x112   : > { %v596_v19 = vrot.slane %v595_v17, 1  ;;  %v609_v20 = vrot.slane %v608_v18, 1 }
 0x114   : > { %v597_v22 = vmax.f32 %v595_v17, %v596_v19  ;;  %v610_v23 = vmax.f32 %v608_v18, %v609_v20 }
 0x116   : > { %v614_v24 = vsel %vm613_vm10, %v610_v23, %v597_v22 }
 0x117   : > { %v616_v25 = vmax.f32 %v584_v21, %v614_v24 }
 0x119   : > { %617 = vst [vmem:[%s1421_s13] sm:$0x3] %v616_v25 }
 0x11a   : > { %s839_s10 = sshll.u32 %s1429_s30, 5  ;;  %s648_s5 = sshll.u32 %s1372_s6, 4  ;;  %s649_s5 = int_to_ptr.vmem [resolvable:$true] %s648_s5 }
 0x11b   : > { %s1567_s3 = sld [smem:[#allocation18_spill]]  ;;  %s1130_s8 = smov 512  }
 0x11c   : > { %890 = sst [smem:[#allocation8]] (%p1246_p7), %s1130_s8  ;;  %s1131_s2 = smov 2048  }
 0x11d   : > { %891 = sst [smem:[#allocation8 + $0x1]] (%p1246_p7), %s1131_s2  ;;  %s1132_s29 = smov 8  }
 0x11e   : > { %892 = sst [smem:[#allocation8 + $0x2]] (%p1246_p7), %s1132_s29  ;;  %s1133_s30 = smov 64  }
 0x11f   : > { %893 = sst [smem:[#allocation8 + $0x3]] (%p1246_p7), %s1133_s30  ;;  %s1134_s0 = smov 4  }
 0x120   : > { %894 = sst [smem:[#allocation8 + $0x4]] (%p1246_p7), %s1133_s30  ;;  %s1135_s6 = smov [#allocation7]  }
 0x121   : > { %s637_s1 = scalar_lea.hbm %s1567_s3, %s839_s10  ;;  %895 = sst [smem:[#allocation8 + $0x5]] (%p1246_p7), %s1134_s0 }
 0x122   : > { %s650_s12 = sshll.u32 %s637_s1, 4  ;;  %s1136_s1 = smov 0   ;;  %s651_s12 = int_to_ptr.hbm [resolvable:$true] %s650_s12 }
 0x123   : > { %896 = dma.general (%p1246_p7), %s649_s5, 1024, %s651_s12, %s619_s21, %s1135_s6, [#allocation8], %s1136_s1, 0  }
 0x124   : > { %s1568_s26 = sshll.u32 %s1115_s22, 1  ;;  %s678_s29 = sshll.u32 %s1421_s13, 4  ;;  %s679_s29 = int_to_ptr.vmem [resolvable:$true] %s678_s29 }
 0x125   : > { %s676_s2 = scalar_lea.hbm %s1543_s4, %s1568_s26  ;;  %s1025_s22 = scalar_lea.hbm %s1543_s4, 4 }
 0x126   : > { %s680_s3 = sshll.u32 %s676_s2, 4  ;;  %s681_s3 = int_to_ptr.hbm [resolvable:$true] %s680_s3 }
 0x127   : > { %s1019_s30 = sshra.s32 %s681_s3, 4  ;;  %s1020_s30 = int_to_ptr.hbm [resolvable:$true] %s1019_s30 }
 0x128   : > { %s1021_s28 = scalar_lea.hbm %s1020_s30, 2  ;;  %p1026_p7 = scmp.lt.s32.totalorder %s1020_s30, %s1543_s4 }
 0x129   : > { %p1022_p8 = scmp.ne.s32.totalorder %s1020_s30, %s1021_s28  ;;  %p1027_p12 = scmp.lt.s32.totalorder %s1025_s22, %s1021_s28 }
 0x12b   : > { %p1023_p10 = pnand %p1022_p8, %p1278_p0  ;;  %p1028_p13 = por %p1027_p12, %p1026_p7 }
 0x12d   : > { %p1024_p11 = pneg %p1023_p10 }
 0x12f   : > { %p1029_p2 = pnand %p1028_p13, %p1024_p11 }
 0x131   : > { %1032 = shalt.err (!%p1029_p2)
}
 0x132   : > { %897 = dma.vmem_to_hbm [thread:$0]  (%p1278_p0), %s679_s29, 32, %s681_s3, %s1461_s7  }
 0x133 PF: > { %s1569_s13 = sld [smem:[#allocation11_spill]]  ;;  %p907_p3 = scmp.ge.s32.totalorder %s1127_s25, 2 }
 0x135   : > { %p901_p4 = pnand %p907_p3, %p1260_p9 }
 0x137   : > { %p902_p5 = pneg %p901_p4 }
 0x139   : > { %s692_s0 = sand.u32 1, %s1569_s13  }
 0x13a   : > { %s693_s6 = scalar_lea.sflag [#allocation4], %s692_s0 }
 0x13b   : > { %1078 = dma.done.wait (%p902_p5), %s693_s6, 1024  }
 0x13c   : > { %1080 = vsyncadd (%p902_p5), %s693_s6, 4294966272  ;;  %s702_s28 = sand.u32 1, %s1087_s15   ;;  %p904_p6 = pnand %p907_p3, %p1284_p1 }
 0x13d   : > { %s703_s18 = scalar_lea.sflag [#allocation6], %s702_s28 }
 0x13e   : > { %p905_p8 = pneg %p904_p6 }
 0x140   : > { %1082 = dma.done.wait (%p905_p8), %s703_s18, 32  }
 0x141   : > { %1084 = vsyncadd (%p905_p8), %s703_s18, 4294967264  ;;  %s21_s25 = sadd.s32 1, %s1127_s25   ;;  %s1570_s21 = sld [smem:[#allocation12_spill]] }
 0x142   : > { %p18_p0 = scmp.ge.s32.totalorder %s21_s25, 6   ;;  %s1571_s3 = sld [smem:[#allocation13_spill]] }
 0x143   : > { %s1572_s14 = sld [smem:[#allocation14_spill]]  ;;  %s1573_s15 = smov %s1091_s16 }
 0x144   : > { %s1574_s16 = smov %s1095_s17  ;;  %s1575_s17 = smov %s1267_s23 }
 0x145   : > { %s1576_s18 = smov %s1103_s19  ;;  %s1577_s19 = smov %s1107_s20 }
 0x146   : > { %s1578_s20 = smov %s1270_s27  ;;  %s1579_s22 = smov %s1123_s24 }
 0x147   :  { %20 = sbr.rel (!%p18_p0) target bundleno = 14 (0xe), region = 136 }
 0x148   : > { %s1580_s23 = smov %s1571_s3 }
 0x149   : > { %s1581_s24 = smov %s1572_s14 }
 0x14c   :  { %709 = vsyncpa [#allocation4], 1 }
 0x14d   :  { %711 = vsyncpa [#allocation4 + $0x1], 1 }
 0x14e   :  { %712 = vsyncpa [#allocation6], 1 }
 0x14f   :  { %714 = vsyncpa [#allocation6 + $0x1], 1 }

</bundles_post_ra>
